<compile_context>
chip_gen: v7x
topology: tpu7x:2x2x1
jax: 0.10.0
libtpu: 0.0.40
codegen_flags: <defaults>
</compile_context>

<pallas_src>
import functools
import math

import jax
import jax.numpy as jnp
from jax.experimental import pallas as pl
from jax.experimental.pallas import tpu as pltpu


def _round_up(x, m):
    return (x + m - 1) // m * m


def _grid_steps_for_batch(n):
    # v7x has 2 TensorCores per chip -> give it 2 parallel grid steps.
    # Single-TC chips (v5e/v6e) get 1 step to avoid per-step pipeline overhead.
    try:
        kind = jax.devices()[0].device_kind.lower()
        dual_tc = "7" in kind
    except Exception:  # pragma: no cover - detection must never break the kernel
        dual_tc = False
    if dual_tc and n >= 2 and n % 2 == 0:
        return 2
    return 1


def _convt_sigmoid_kernel(x_ref, w_ref, ml_ref, mr_ref, o_ref, rhs_ref,
                          *, width, m, b_imgs, c_in):
    # x_ref  : (B, C_in, L)   flattened image, W+1 leading zeros + zero tail slack
    # w_ref  : (C_out, 9*C_in+1) fused weight, last column = bias
    # ml_ref : (1, m)         mask killing kw==0 taps at w==0 (row wrap)
    # mr_ref : (1, m)         mask killing kw==2 taps at w==W-1 (row wrap)
    # o_ref  : (B, C_out, m)  output, NCHW with flattened spatial (lane-dense)
    # rhs_ref: (9*C_in+1, B*m) VMEM scratch holding the fused im2col operand
    for bi in range(b_imgs):
        col0 = bi * m
        for kh in range(3):
            for kw in range(3):
                off = kh * width + kw                       # static tap offset
                s = x_ref[bi, :, pl.ds(off, m)]             # (C_in, m) shifted tap
                if kw == 0:
                    s = s * ml_ref[...]
                elif kw == 2:
                    s = s * mr_ref[...]
                row0 = (kh * 3 + kw) * c_in
                rhs_ref[row0:row0 + c_in, col0:col0 + m] = s
        # ones row -> bias column of the fused weight
        rhs_ref[9 * c_in:9 * c_in + 1, col0:col0 + m] = jnp.ones((1, m), jnp.float32)

    # Single MXU pass: (C_out, 28) @ (28, B*m), bias included.
    acc = jnp.dot(w_ref[...], rhs_ref[...], preferred_element_type=jnp.float32)
    y = jax.nn.sigmoid(acc)                                 # (C_out, B*m), f32 EUP path
    for bi in range(b_imgs):
        o_ref[bi] = y[:, bi * m:(bi + 1) * m].astype(o_ref.dtype)


def prepare_convt_params(w_t, b):
    """Hoisted (init-time) weight prep.

    w_t: (C_in, C_out, 3, 3) PyTorch ConvTranspose2d layout.  b: (C_out,).
    Returns the fused (C_out, 9*C_in + 1) weight: ConvTranspose2d(stride=1, pad=1)
    == Conv2d(pad=1) with the flipped, channel-transposed kernel; columns are
    tap-major (kh*3+kw), channel-minor; last column is the bias."""
    c_in, c_out = w_t.shape[0], w_t.shape[1]
    w_conv = jnp.flip(w_t, axis=(2, 3)).transpose(1, 0, 2, 3)         # (C_out, C_in, 3, 3)
    w_flat = w_conv.transpose(0, 2, 3, 1).reshape(c_out, 9 * c_in)    # col = tap*C_in + ci
    w_fused = jnp.concatenate([w_flat, b.reshape(c_out, 1)], axis=1)
    return w_fused.astype(jnp.float32)


@jax.jit
def conv_transpose_sigmoid(x, w_fused):
    """x: (N, C_in, H, W) NCHW f32.  w_fused: (C_out, 9*C_in+1) from prepare_convt_params.
    Returns sigmoid(conv_transpose2d(x) + b) as (N, C_out, H, W)."""
    N, C_in, H, W = x.shape
    C_out = w_fused.shape[0]
    K = 9 * C_in + 1
    M = H * W

    # Single pad: W+1 leading zeros (covers the top conv pad), zero tail slack
    # (covers the bottom conv pad and keeps the largest tap offset in bounds).
    L = _round_up(M + 2 * W + 2, 128)
    x_flat = jnp.pad(x.reshape(N, C_in, M),
                     ((0, 0), (0, 0), (W + 1, L - M - W - 1)))        # (N, C_in, L)

    # Column-edge masks: the flattened shift wraps rows at the image width, so
    # kw=0 taps are invalid at w==0 and kw=2 taps at w==W-1.  Constants under jit.
    col = jnp.arange(M, dtype=jnp.int32) % W
    mask_l = (col != 0).astype(jnp.float32).reshape(1, M)
    mask_r = (col != W - 1).astype(jnp.float32).reshape(1, M)

    G = _grid_steps_for_batch(N)      # 2 on v7x (dual TC), else 1
    B = N // G                        # images per grid step

    kernel = functools.partial(_convt_sigmoid_kernel,
                               width=W, m=M, b_imgs=B, c_in=C_in)

    out_flat = pl.pallas_call(
        kernel,
        out_shape=jax.ShapeDtypeStruct((N, C_out, M), x.dtype),
        grid_spec=pltpu.PrefetchScalarGridSpec(
            num_scalar_prefetch=0,
            grid=(G,),
            in_specs=[
                pl.BlockSpec((B, C_in, L), lambda g: (g, 0, 0)),
                pl.BlockSpec((C_out, K), lambda g: (0, 0)),
                pl.BlockSpec((1, M), lambda g: (0, 0)),
                pl.BlockSpec((1, M), lambda g: (0, 0)),
            ],
            out_specs=pl.BlockSpec((B, C_out, M), lambda g: (g, 0, 0)),
            scratch_shapes=[pltpu.VMEM((K, B * M), jnp.float32)],
        ),
        compiler_params=pltpu.CompilerParams(
            dimension_semantics=("parallel",)),
    )(x_flat, w_fused, mask_l, mask_r)

    # Already NCHW with flattened spatial -> free reshape, no HBM transpose.
    return out_flat.reshape(N, C_out, H, W)


def _reference(x, w_t, b):
    # Pure-JAX reference: conv with flipped/transposed kernel + bias + sigmoid.
    w_conv = jnp.flip(w_t, axis=(2, 3)).transpose(1, 0, 2, 3)
    y = jax.lax.conv_general_dilated(
        x, w_conv, window_strides=(1, 1), padding=((1, 1), (1, 1)),
        dimension_numbers=("NCHW", "OIHW", "NCHW"))
    return jax.nn.sigmoid(y + b.reshape(1, -1, 1, 1))


if __name__ == "__main__":
    key = jax.random.PRNGKey(0)
    kx, kw, kb = jax.random.split(key, 3)

    # Small shapes consistent with the module: C_in=3 fixed by the conv, C_out=32.
    N, C_in, H, W = 2, 3, 16, 16
    C_out = 32

    x = jax.random.normal(kx, (N, C_in, H, W), dtype=jnp.float32)
    fan = C_in * 3 * 3
    bound = 1.0 / math.sqrt(fan)
    w_t = jax.random.uniform(kw, (C_in, C_out, 3, 3), minval=-bound, maxval=bound,
                             dtype=jnp.float32)
    b = jax.random.uniform(kb, (C_out,), minval=-bound, maxval=bound,
                           dtype=jnp.float32)

    # Weight prep hoisted out of the forward path (done once at "init").
    w_fused = prepare_convt_params(w_t, b)

    out = jax.block_until_ready(conv_transpose_sigmoid(x, w_fused))
    ref = jax.block_until_ready(_reference(x, w_t, b))

    assert out.shape == (N, C_out, H, W)
    assert jnp.allclose(out, ref, atol=1e-5, rtol=1e-5)

    print("KERNEL_OK")
</pallas_src>

<mosaic_0001>
module attributes {stable_mosaic.version = 11 : i64} {
  func.func @_convt_sigmoid_kernel(%arg0: i32, %arg1: memref<2x3x384xf32, #tpu.memory_space<vmem>>, %arg2: memref<32x28xf32, #tpu.memory_space<vmem>>, %arg3: memref<1x256xf32, #tpu.memory_space<vmem>>, %arg4: memref<1x256xf32, #tpu.memory_space<vmem>>, %arg5: memref<2x32x256xf32, #tpu.memory_space<vmem>>, %arg6: memref<28x512xf32, #tpu.memory_space<vmem>>) attributes {dimension_semantics = [#tpu.dimension_semantics<parallel>], iteration_bounds = array<i64: 1>, scalar_prefetch = 0 : i64, scratch_operands = 1 : i64, tpu.core_type = #tpu.core_type<tc>, window_params = [{transform_indices = @transform_0, window_bounds = array<i64: 2, 3, 384>}, {pipeline_mode = #tpu.pipeline_mode<synchronous>, transform_indices = @transform_1, window_bounds = array<i64: 32, 28>}, {pipeline_mode = #tpu.pipeline_mode<synchronous>, transform_indices = @transform_2, window_bounds = array<i64: 1, 256>}, {pipeline_mode = #tpu.pipeline_mode<synchronous>, transform_indices = @transform_3, window_bounds = array<i64: 1, 256>}, {transform_indices = @transform_4, window_bounds = array<i64: 2, 32, 256>}]} {
    %c0 = arith.constant 0 : index
    %c0_0 = arith.constant 0 : index
    %c0_1 = arith.constant 0 : index
    %0 = vector.load %arg1[%c0, %c0_0, %c0_1] : memref<2x3x384xf32, #tpu.memory_space<vmem>>, vector<1x3x256xf32>
    %1 = vector.shape_cast %0 : vector<1x3x256xf32> to vector<3x256xf32>
    %c0_2 = arith.constant 0 : index
    %c0_3 = arith.constant 0 : index
    %2 = vector.load %arg3[%c0_2, %c0_3] : memref<1x256xf32, #tpu.memory_space<vmem>>, vector<1x256xf32>
    %3 = vector.broadcast %2 : vector<1x256xf32> to vector<3x256xf32>
    %4 = arith.mulf %1, %3 : vector<3x256xf32>
    %c0_4 = arith.constant 0 : index
    %c0_5 = arith.constant 0 : index
    %5 = vector.load %arg6[%c0_4, %c0_5] : memref<28x512xf32, #tpu.memory_space<vmem>>, vector<3x256xf32>
    tpu.vector_store %arg6[%c0_4, %c0_5], %4 {strides = array<i32>} : memref<28x512xf32, #tpu.memory_space<vmem>>, vector<3x256xf32>,
    %c0_6 = arith.constant 0 : index
    %c0_7 = arith.constant 0 : index
    %c1 = arith.constant 1 : index
    %6 = vector.load %arg1[%c0_6, %c0_7, %c1] : memref<2x3x384xf32, #tpu.memory_space<vmem>>, vector<1x3x256xf32>
    %7 = vector.shape_cast %6 : vector<1x3x256xf32> to vector<3x256xf32>
    %c3 = arith.constant 3 : index
    %c0_8 = arith.constant 0 : index
    %8 = vector.load %arg6[%c3, %c0_8] : memref<28x512xf32, #tpu.memory_space<vmem>>, vector<3x256xf32>
    tpu.vector_store %arg6[%c3, %c0_8], %7 {strides = array<i32>} : memref<28x512xf32, #tpu.memory_space<vmem>>, vector<3x256xf32>,
    %c0_9 = arith.constant 0 : index
    %c0_10 = arith.constant 0 : index
    %c2 = arith.constant 2 : index
    %9 = vector.load %arg1[%c0_9, %c0_10, %c2] : memref<2x3x384xf32, #tpu.memory_space<vmem>>, vector<1x3x256xf32>
    %10 = vector.shape_cast %9 : vector<1x3x256xf32> to vector<3x256xf32>
    %c0_11 = arith.constant 0 : index
    %c0_12 = arith.constant 0 : index
    %11 = vector.load %arg4[%c0_11, %c0_12] : memref<1x256xf32, #tpu.memory_space<vmem>>, vector<1x256xf32>
    %12 = vector.broadcast %11 : vector<1x256xf32> to vector<3x256xf32>
    %13 = arith.mulf %10, %12 : vector<3x256xf32>
    %c6 = arith.constant 6 : index
    %c0_13 = arith.constant 0 : index
    %14 = vector.load %arg6[%c6, %c0_13] : memref<28x512xf32, #tpu.memory_space<vmem>>, vector<3x256xf32>
    tpu.vector_store %arg6[%c6, %c0_13], %13 {strides = array<i32>} : memref<28x512xf32, #tpu.memory_space<vmem>>, vector<3x256xf32>,
    %c0_14 = arith.constant 0 : index
    %c0_15 = arith.constant 0 : index
    %c16 = arith.constant 16 : index
    %15 = vector.load %arg1[%c0_14, %c0_15, %c16] : memref<2x3x384xf32, #tpu.memory_space<vmem>>, vector<1x3x256xf32>
    %16 = vector.shape_cast %15 : vector<1x3x256xf32> to vector<3x256xf32>
    %c0_16 = arith.constant 0 : index
    %c0_17 = arith.constant 0 : index
    %17 = vector.load %arg3[%c0_16, %c0_17] : memref<1x256xf32, #tpu.memory_space<vmem>>, vector<1x256xf32>
    %18 = vector.broadcast %17 : vector<1x256xf32> to vector<3x256xf32>
    %19 = arith.mulf %16, %18 : vector<3x256xf32>
    %c9 = arith.constant 9 : index
    %c0_18 = arith.constant 0 : index
    %20 = vector.load %arg6[%c9, %c0_18] : memref<28x512xf32, #tpu.memory_space<vmem>>, vector<3x256xf32>
    tpu.vector_store %arg6[%c9, %c0_18], %19 {strides = array<i32>} : memref<28x512xf32, #tpu.memory_space<vmem>>, vector<3x256xf32>,
    %c0_19 = arith.constant 0 : index
    %c0_20 = arith.constant 0 : index
    %c17 = arith.constant 17 : index
    %21 = vector.load %arg1[%c0_19, %c0_20, %c17] : memref<2x3x384xf32, #tpu.memory_space<vmem>>, vector<1x3x256xf32>
    %22 = vector.shape_cast %21 : vector<1x3x256xf32> to vector<3x256xf32>
    %c12 = arith.constant 12 : index
    %c0_21 = arith.constant 0 : index
    %23 = vector.load %arg6[%c12, %c0_21] : memref<28x512xf32, #tpu.memory_space<vmem>>, vector<3x256xf32>
    tpu.vector_store %arg6[%c12, %c0_21], %22 {strides = array<i32>} : memref<28x512xf32, #tpu.memory_space<vmem>>, vector<3x256xf32>,
    %c0_22 = arith.constant 0 : index
    %c0_23 = arith.constant 0 : index
    %c18 = arith.constant 18 : index
    %24 = vector.load %arg1[%c0_22, %c0_23, %c18] : memref<2x3x384xf32, #tpu.memory_space<vmem>>, vector<1x3x256xf32>
    %25 = vector.shape_cast %24 : vector<1x3x256xf32> to vector<3x256xf32>
    %c0_24 = arith.constant 0 : index
    %c0_25 = arith.constant 0 : index
    %26 = vector.load %arg4[%c0_24, %c0_25] : memref<1x256xf32, #tpu.memory_space<vmem>>, vector<1x256xf32>
    %27 = vector.broadcast %26 : vector<1x256xf32> to vector<3x256xf32>
    %28 = arith.mulf %25, %27 : vector<3x256xf32>
    %c15 = arith.constant 15 : index
    %c0_26 = arith.constant 0 : index
    %29 = vector.load %arg6[%c15, %c0_26] : memref<28x512xf32, #tpu.memory_space<vmem>>, vector<3x256xf32>
    tpu.vector_store %arg6[%c15, %c0_26], %28 {strides = array<i32>} : memref<28x512xf32, #tpu.memory_space<vmem>>, vector<3x256xf32>,
    %c0_27 = arith.constant 0 : index
    %c0_28 = arith.constant 0 : index
    %c32 = arith.constant 32 : index
    %30 = vector.load %arg1[%c0_27, %c0_28, %c32] : memref<2x3x384xf32, #tpu.memory_space<vmem>>, vector<1x3x256xf32>
    %31 = vector.shape_cast %30 : vector<1x3x256xf32> to vector<3x256xf32>
    %c0_29 = arith.constant 0 : index
    %c0_30 = arith.constant 0 : index
    %32 = vector.load %arg3[%c0_29, %c0_30] : memref<1x256xf32, #tpu.memory_space<vmem>>, vector<1x256xf32>
    %33 = vector.broadcast %32 : vector<1x256xf32> to vector<3x256xf32>
    %34 = arith.mulf %31, %33 : vector<3x256xf32>
    %c18_31 = arith.constant 18 : index
    %c0_32 = arith.constant 0 : index
    %35 = vector.load %arg6[%c18_31, %c0_32] : memref<28x512xf32, #tpu.memory_space<vmem>>, vector<3x256xf32>
    tpu.vector_store %arg6[%c18_31, %c0_32], %34 {strides = array<i32>} : memref<28x512xf32, #tpu.memory_space<vmem>>, vector<3x256xf32>,
    %c0_33 = arith.constant 0 : index
    %c0_34 = arith.constant 0 : index
    %c33 = arith.constant 33 : index
    %36 = vector.load %arg1[%c0_33, %c0_34, %c33] : memref<2x3x384xf32, #tpu.memory_space<vmem>>, vector<1x3x256xf32>
    %37 = vector.shape_cast %36 : vector<1x3x256xf32> to vector<3x256xf32>
    %c21 = arith.constant 21 : index
    %c0_35 = arith.constant 0 : index
    %38 = vector.load %arg6[%c21, %c0_35] : memref<28x512xf32, #tpu.memory_space<vmem>>, vector<3x256xf32>
    tpu.vector_store %arg6[%c21, %c0_35], %37 {strides = array<i32>} : memref<28x512xf32, #tpu.memory_space<vmem>>, vector<3x256xf32>,
    %c0_36 = arith.constant 0 : index
    %c0_37 = arith.constant 0 : index
    %c34 = arith.constant 34 : index
    %39 = vector.load %arg1[%c0_36, %c0_37, %c34] : memref<2x3x384xf32, #tpu.memory_space<vmem>>, vector<1x3x256xf32>
    %40 = vector.shape_cast %39 : vector<1x3x256xf32> to vector<3x256xf32>
    %c0_38 = arith.constant 0 : index
    %c0_39 = arith.constant 0 : index
    %41 = vector.load %arg4[%c0_38, %c0_39] : memref<1x256xf32, #tpu.memory_space<vmem>>, vector<1x256xf32>
    %42 = vector.broadcast %41 : vector<1x256xf32> to vector<3x256xf32>
    %43 = arith.mulf %40, %42 : vector<3x256xf32>
    %c24 = arith.constant 24 : index
    %c0_40 = arith.constant 0 : index
    %44 = vector.load %arg6[%c24, %c0_40] : memref<28x512xf32, #tpu.memory_space<vmem>>, vector<3x256xf32>
    tpu.vector_store %arg6[%c24, %c0_40], %43 {strides = array<i32>} : memref<28x512xf32, #tpu.memory_space<vmem>>, vector<3x256xf32>,
    %cst = arith.constant 1.000000e+00 : f32
    %45 = vector.broadcast %cst : f32 to vector<1x256xf32>
    %c27 = arith.constant 27 : index
    %c0_41 = arith.constant 0 : index
    %46 = vector.load %arg6[%c27, %c0_41] : memref<28x512xf32, #tpu.memory_space<vmem>>, vector<1x256xf32>
    tpu.vector_store %arg6[%c27, %c0_41], %45 {strides = array<i32>} : memref<28x512xf32, #tpu.memory_space<vmem>>, vector<1x256xf32>,
    %c1_42 = arith.constant 1 : index
    %c0_43 = arith.constant 0 : index
    %c0_44 = arith.constant 0 : index
    %47 = vector.load %arg1[%c1_42, %c0_43, %c0_44] : memref<2x3x384xf32, #tpu.memory_space<vmem>>, vector<1x3x256xf32>
    %48 = vector.shape_cast %47 : vector<1x3x256xf32> to vector<3x256xf32>
    %c0_45 = arith.constant 0 : index
    %c0_46 = arith.constant 0 : index
    %49 = vector.load %arg3[%c0_45, %c0_46] : memref<1x256xf32, #tpu.memory_space<vmem>>, vector<1x256xf32>
    %50 = vector.broadcast %49 : vector<1x256xf32> to vector<3x256xf32>
    %51 = arith.mulf %48, %50 : vector<3x256xf32>
    %c0_47 = arith.constant 0 : index
    %c256 = arith.constant 256 : index
    %52 = vector.load %arg6[%c0_47, %c256] : memref<28x512xf32, #tpu.memory_space<vmem>>, vector<3x256xf32>
    tpu.vector_store %arg6[%c0_47, %c256], %51 {strides = array<i32>} : memref<28x512xf32, #tpu.memory_space<vmem>>, vector<3x256xf32>,
    %c1_48 = arith.constant 1 : index
    %c0_49 = arith.constant 0 : index
    %c1_50 = arith.constant 1 : index
    %53 = vector.load %arg1[%c1_48, %c0_49, %c1_50] : memref<2x3x384xf32, #tpu.memory_space<vmem>>, vector<1x3x256xf32>
    %54 = vector.shape_cast %53 : vector<1x3x256xf32> to vector<3x256xf32>
    %c3_51 = arith.constant 3 : index
    %c256_52 = arith.constant 256 : index
    %55 = vector.load %arg6[%c3_51, %c256_52] : memref<28x512xf32, #tpu.memory_space<vmem>>, vector<3x256xf32>
    tpu.vector_store %arg6[%c3_51, %c256_52], %54 {strides = array<i32>} : memref<28x512xf32, #tpu.memory_space<vmem>>, vector<3x256xf32>,
    %c1_53 = arith.constant 1 : index
    %c0_54 = arith.constant 0 : index
    %c2_55 = arith.constant 2 : index
    %56 = vector.load %arg1[%c1_53, %c0_54, %c2_55] : memref<2x3x384xf32, #tpu.memory_space<vmem>>, vector<1x3x256xf32>
    %57 = vector.shape_cast %56 : vector<1x3x256xf32> to vector<3x256xf32>
    %c0_56 = arith.constant 0 : index
    %c0_57 = arith.constant 0 : index
    %58 = vector.load %arg4[%c0_56, %c0_57] : memref<1x256xf32, #tpu.memory_space<vmem>>, vector<1x256xf32>
    %59 = vector.broadcast %58 : vector<1x256xf32> to vector<3x256xf32>
    %60 = arith.mulf %57, %59 : vector<3x256xf32>
    %c6_58 = arith.constant 6 : index
    %c256_59 = arith.constant 256 : index
    %61 = vector.load %arg6[%c6_58, %c256_59] : memref<28x512xf32, #tpu.memory_space<vmem>>, vector<3x256xf32>
    tpu.vector_store %arg6[%c6_58, %c256_59], %60 {strides = array<i32>} : memref<28x512xf32, #tpu.memory_space<vmem>>, vector<3x256xf32>,
    %c1_60 = arith.constant 1 : index
    %c0_61 = arith.constant 0 : index
    %c16_62 = arith.constant 16 : index
    %62 = vector.load %arg1[%c1_60, %c0_61, %c16_62] : memref<2x3x384xf32, #tpu.memory_space<vmem>>, vector<1x3x256xf32>
    %63 = vector.shape_cast %62 : vector<1x3x256xf32> to vector<3x256xf32>
    %c0_63 = arith.constant 0 : index
    %c0_64 = arith.constant 0 : index
    %64 = vector.load %arg3[%c0_63, %c0_64] : memref<1x256xf32, #tpu.memory_space<vmem>>, vector<1x256xf32>
    %65 = vector.broadcast %64 : vector<1x256xf32> to vector<3x256xf32>
    %66 = arith.mulf %63, %65 : vector<3x256xf32>
    %c9_65 = arith.constant 9 : index
    %c256_66 = arith.constant 256 : index
    %67 = vector.load %arg6[%c9_65, %c256_66] : memref<28x512xf32, #tpu.memory_space<vmem>>, vector<3x256xf32>
    tpu.vector_store %arg6[%c9_65, %c256_66], %66 {strides = array<i32>} : memref<28x512xf32, #tpu.memory_space<vmem>>, vector<3x256xf32>,
    %c1_67 = arith.constant 1 : index
    %c0_68 = arith.constant 0 : index
    %c17_69 = arith.constant 17 : index
    %68 = vector.load %arg1[%c1_67, %c0_68, %c17_69] : memref<2x3x384xf32, #tpu.memory_space<vmem>>, vector<1x3x256xf32>
    %69 = vector.shape_cast %68 : vector<1x3x256xf32> to vector<3x256xf32>
    %c12_70 = arith.constant 12 : index
    %c256_71 = arith.constant 256 : index
    %70 = vector.load %arg6[%c12_70, %c256_71] : memref<28x512xf32, #tpu.memory_space<vmem>>, vector<3x256xf32>
    tpu.vector_store %arg6[%c12_70, %c256_71], %69 {strides = array<i32>} : memref<28x512xf32, #tpu.memory_space<vmem>>, vector<3x256xf32>,
    %c1_72 = arith.constant 1 : index
    %c0_73 = arith.constant 0 : index
    %c18_74 = arith.constant 18 : index
    %71 = vector.load %arg1[%c1_72, %c0_73, %c18_74] : memref<2x3x384xf32, #tpu.memory_space<vmem>>, vector<1x3x256xf32>
    %72 = vector.shape_cast %71 : vector<1x3x256xf32> to vector<3x256xf32>
    %c0_75 = arith.constant 0 : index
    %c0_76 = arith.constant 0 : index
    %73 = vector.load %arg4[%c0_75, %c0_76] : memref<1x256xf32, #tpu.memory_space<vmem>>, vector<1x256xf32>
    %74 = vector.broadcast %73 : vector<1x256xf32> to vector<3x256xf32>
    %75 = arith.mulf %72, %74 : vector<3x256xf32>
    %c15_77 = arith.constant 15 : index
    %c256_78 = arith.constant 256 : index
    %76 = vector.load %arg6[%c15_77, %c256_78] : memref<28x512xf32, #tpu.memory_space<vmem>>, vector<3x256xf32>
    tpu.vector_store %arg6[%c15_77, %c256_78], %75 {strides = array<i32>} : memref<28x512xf32, #tpu.memory_space<vmem>>, vector<3x256xf32>,
    %c1_79 = arith.constant 1 : index
    %c0_80 = arith.constant 0 : index
    %c32_81 = arith.constant 32 : index
    %77 = vector.load %arg1[%c1_79, %c0_80, %c32_81] : memref<2x3x384xf32, #tpu.memory_space<vmem>>, vector<1x3x256xf32>
    %78 = vector.shape_cast %77 : vector<1x3x256xf32> to vector<3x256xf32>
    %c0_82 = arith.constant 0 : index
    %c0_83 = arith.constant 0 : index
    %79 = vector.load %arg3[%c0_82, %c0_83] : memref<1x256xf32, #tpu.memory_space<vmem>>, vector<1x256xf32>
    %80 = vector.broadcast %79 : vector<1x256xf32> to vector<3x256xf32>
    %81 = arith.mulf %78, %80 : vector<3x256xf32>
    %c18_84 = arith.constant 18 : index
    %c256_85 = arith.constant 256 : index
    %82 = vector.load %arg6[%c18_84, %c256_85] : memref<28x512xf32, #tpu.memory_space<vmem>>, vector<3x256xf32>
    tpu.vector_store %arg6[%c18_84, %c256_85], %81 {strides = array<i32>} : memref<28x512xf32, #tpu.memory_space<vmem>>, vector<3x256xf32>,
    %c1_86 = arith.constant 1 : index
    %c0_87 = arith.constant 0 : index
    %c33_88 = arith.constant 33 : index
    %83 = vector.load %arg1[%c1_86, %c0_87, %c33_88] : memref<2x3x384xf32, #tpu.memory_space<vmem>>, vector<1x3x256xf32>
    %84 = vector.shape_cast %83 : vector<1x3x256xf32> to vector<3x256xf32>
    %c21_89 = arith.constant 21 : index
    %c256_90 = arith.constant 256 : index
    %85 = vector.load %arg6[%c21_89, %c256_90] : memref<28x512xf32, #tpu.memory_space<vmem>>, vector<3x256xf32>
    tpu.vector_store %arg6[%c21_89, %c256_90], %84 {strides = array<i32>} : memref<28x512xf32, #tpu.memory_space<vmem>>, vector<3x256xf32>,
    %c1_91 = arith.constant 1 : index
    %c0_92 = arith.constant 0 : index
    %c34_93 = arith.constant 34 : index
    %86 = vector.load %arg1[%c1_91, %c0_92, %c34_93] : memref<2x3x384xf32, #tpu.memory_space<vmem>>, vector<1x3x256xf32>
    %87 = vector.shape_cast %86 : vector<1x3x256xf32> to vector<3x256xf32>
    %c0_94 = arith.constant 0 : index
    %c0_95 = arith.constant 0 : index
    %88 = vector.load %arg4[%c0_94, %c0_95] : memref<1x256xf32, #tpu.memory_space<vmem>>, vector<1x256xf32>
    %89 = vector.broadcast %88 : vector<1x256xf32> to vector<3x256xf32>
    %90 = arith.mulf %87, %89 : vector<3x256xf32>
    %c24_96 = arith.constant 24 : index
    %c256_97 = arith.constant 256 : index
    %91 = vector.load %arg6[%c24_96, %c256_97] : memref<28x512xf32, #tpu.memory_space<vmem>>, vector<3x256xf32>
    tpu.vector_store %arg6[%c24_96, %c256_97], %90 {strides = array<i32>} : memref<28x512xf32, #tpu.memory_space<vmem>>, vector<3x256xf32>,
    %cst_98 = arith.constant 1.000000e+00 : f32
    %92 = vector.broadcast %cst_98 : f32 to vector<1x256xf32>
    %c27_99 = arith.constant 27 : index
    %c256_100 = arith.constant 256 : index
    %93 = vector.load %arg6[%c27_99, %c256_100] : memref<28x512xf32, #tpu.memory_space<vmem>>, vector<1x256xf32>
    tpu.vector_store %arg6[%c27_99, %c256_100], %92 {strides = array<i32>} : memref<28x512xf32, #tpu.memory_space<vmem>>, vector<1x256xf32>,
    %c0_101 = arith.constant 0 : index
    %c0_102 = arith.constant 0 : index
    %94 = vector.load %arg2[%c0_101, %c0_102] : memref<32x28xf32, #tpu.memory_space<vmem>>, vector<32x28xf32>
    %c0_103 = arith.constant 0 : index
    %c0_104 = arith.constant 0 : index
    %95 = vector.load %arg6[%c0_103, %c0_104] : memref<28x512xf32, #tpu.memory_space<vmem>>, vector<28x512xf32>
    %cst_105 = arith.constant dense<0.000000e+00> : vector<32x512xf32>
    %96 = tpu.matmul %94, %95, %cst_105 {dimension_numbers = #tpu.dot_dimension_numbers<[1], [0], [0], [1], [0, 0, 1, 1], [], []>} : vector<32x28xf32>, vector<28x512xf32>, vector<32x512xf32> -> vector<32x512xf32>
    %97 = arith.negf %96 : vector<32x512xf32>
    %98 = math.exp %97 : vector<32x512xf32>
    %cst_106 = arith.constant 1.000000e+00 : f32
    %99 = vector.broadcast %cst_106 : f32 to vector<32x512xf32>
    %100 = arith.addf %99, %98 : vector<32x512xf32>
    %101 = arith.divf %99, %100 : vector<32x512xf32>
    %102 = vector.extract_strided_slice %101 {offsets = [0, 0], sizes = [32, 256], strides = [1, 1]} : vector<32x512xf32> to vector<32x256xf32>
    %c0_107 = arith.constant 0 : index
    %c0_108 = arith.constant 0 : index
    %c0_109 = arith.constant 0 : index
    %103 = vector.load %arg5[%c0_107, %c0_108, %c0_109] : memref<2x32x256xf32, #tpu.memory_space<vmem>>, vector<1x32x256xf32>
    %104 = vector.shape_cast %103 : vector<1x32x256xf32> to vector<32x256xf32>
    %105 = vector.shape_cast %102 : vector<32x256xf32> to vector<1x32x256xf32>
    tpu.vector_store %arg5[%c0_107, %c0_108, %c0_109], %105 {strides = array<i32>} : memref<2x32x256xf32, #tpu.memory_space<vmem>>, vector<1x32x256xf32>,
    %106 = vector.extract_strided_slice %101 {offsets = [0, 256], sizes = [32, 256], strides = [1, 1]} : vector<32x512xf32> to vector<32x256xf32>
    %c1_110 = arith.constant 1 : index
    %c0_111 = arith.constant 0 : index
    %c0_112 = arith.constant 0 : index
    %107 = vector.load %arg5[%c1_110, %c0_111, %c0_112] : memref<2x32x256xf32, #tpu.memory_space<vmem>>, vector<1x32x256xf32>
    %108 = vector.shape_cast %107 : vector<1x32x256xf32> to vector<32x256xf32>
    %109 = vector.shape_cast %106 : vector<32x256xf32> to vector<1x32x256xf32>
    tpu.vector_store %arg5[%c1_110, %c0_111, %c0_112], %109 {strides = array<i32>} : memref<2x32x256xf32, #tpu.memory_space<vmem>>, vector<1x32x256xf32>,
    return
  }
  func.func @transform_0(%arg0: i32) -> (i32, i32, i32) {
    %c0_i32 = arith.constant 0 : i32
    %c0_i32_0 = arith.constant 0 : i32
    %c0_i32_1 = arith.constant 0 : i32
    return %arg0, %c0_i32, %c0_i32_0 : i32, i32, i32
  }
  func.func @transform_1(%arg0: i32) -> (i32, i32) {
    %c0_i32 = arith.constant 0 : i32
    %c0_i32_0 = arith.constant 0 : i32
    %c0_i32_1 = arith.constant 0 : i32
    return %c0_i32, %c0_i32_0 : i32, i32
  }
  func.func @transform_2(%arg0: i32) -> (i32, i32) {
    %c0_i32 = arith.constant 0 : i32
    %c0_i32_0 = arith.constant 0 : i32
    %c0_i32_1 = arith.constant 0 : i32
    return %c0_i32, %c0_i32_0 : i32, i32
  }
  func.func @transform_3(%arg0: i32) -> (i32, i32) {
    %c0_i32 = arith.constant 0 : i32
    %c0_i32_0 = arith.constant 0 : i32
    %c0_i32_1 = arith.constant 0 : i32
    return %c0_i32, %c0_i32_0 : i32, i32
  }
  func.func @transform_4(%arg0: i32) -> (i32, i32, i32) {
    %c0_i32 = arith.constant 0 : i32
    %c0_i32_0 = arith.constant 0 : i32
    %c0_i32_1 = arith.constant 0 : i32
    return %arg0, %c0_i32, %c0_i32_0 : i32, i32, i32
  }
}

</mosaic_0001>

<bundles_post_ra>
// kernel: conv_transpose_sigmoid.1
= control target key start
LH: loop header
LB: loop body
LE: loop exit
PB: predicated region body
PF: predicated region fallthrough
CT: control target
= control target key end

     0   :  { %v20_v0 = vlaneseq  ;;  %s1089_s11 = smov 2   ;;  %s1090_s12 = smov 18   ;;  %vm116_vm0 = vcmask 130048   ;;  %vm281_vm1 = vcmask 277504   ;;  %vm176_vm2 = vcmask 146432   ;;  %s1545_s3 = inlined_call_operand.vmem [shape: f32[1,256], index: 3, kind: input, shape index: {}]   ;;  %s1546_s2 = inlined_call_operand.vmem [shape: f32[1,256], index: 2, kind: input, shape index: {}]   ;;  %s1547_s0 = inlined_call_operand.vmem [shape: f32[2,3,384], index: 0, kind: input, shape index: {}]   ;;  %s1548_s1 = inlined_call_operand.vmem [shape: f32[32,28], index: 1, kind: input, shape index: {}]   ;;  %s1549_s4 = inlined_call_operand.vmem [shape: f32[2,32,256], index: 4, kind: output, shape index: {}]  }
   0x1   :  { %v59_v2 = vld [vmem:[%s1545_s3] sm:$0x3]  ;;  %v928_v23 = vld [vmem:[%s1547_s0 + $0xc] sm:$0x77]  ;;  %s1091_s15 = smov 16   ;;  %s1092_s21 = smov 32  }
   0x2   :  { %v21_v1 = vshrl.u32 %v20_v0, 7  ;;  %v162_v3 = vld [vmem:[%s1545_s3] sm:$0x3]  ;;  %v37_v60 = vld [vmem:[%s1547_s0 + $0x8] sm:$0x7]  ;;  %s1093_s23 = smov 34  }
   0x3   :  { %v102_v6 = vld [vmem:[%s1546_s2] sm:$0x3]  ;;  %v43_v62 = vrot.slane %v37_v60, 5  ;;  %v929_v63 = vld [vmem:[%s1547_s0 + $0xc] sm:$0x77]  ;;  %s1094_s26 = smov 127  }
   0x4   :  { %v1137_v4 = vsub.s32 0, %v21_v1  ;;  %v1139_v5 = vsub.s32 1, %v21_v1  ;;  %v312_v7 = vld [vmem:[%s1546_s2] sm:$0x3]  ;;  %s1095_s7 = smov 111   ;;  %s1096_s19 = smov 95  }
   0x5   :  { %v18_v8 = vld [vmem:[%s1546_s2] sm:$0x3]  ;;  %v1019_v1 = vld [vmem:[%s1547_s0 + $0x8] ss:$0 sps:$4 sm:$0x77]   ;;  %vm50_vm3 = vcmask 1039360  }
   0x6   :  { %v64_v9 = vrot.slane %v59_v2, %v1137_v4  ;;  %v68_v10 = vrot.slane %v59_v2, %v1139_v5  ;;  %v167_v11 = vrot.slane %v162_v3, %v1137_v4  ;;  %v171_v12 = vrot.slane %v162_v3, %v1139_v5  ;;  %v352_v13 = vld [vmem:[%s1545_s3] sm:$0x3]  ;;  %s1097_s5 = smov 94   ;;  %s1098_s10 = smov 112  }
   0x7   :  { %v107_v14 = vrot.slane %v102_v6, %v1137_v4  ;;  %v111_v15 = vrot.slane %v102_v6, %v1139_v5  ;;  %v317_v16 = vrot.slane %v312_v7, %v1137_v4  ;;  %v321_v17 = vrot.slane %v312_v7, %v1139_v5  ;;  %v393_v18 = vld [vmem:[%s1546_s2] sm:$0x3]  ;;  %v1022_v7 = vld [vmem:[%s1547_s0 + $0x14] ss:$0 sps:$4 sm:$0x77]   ;;  %s1100_s13 = smov 126  }
   0x8   :  { %v69_v19 = vcombine.low %v64_v9, %v68_v10  ;;  %v172_v20 = vcombine.low %v167_v11, %v171_v12  ;;  %v23_v21 = vrot.slane %v18_v8, %v1137_v4  ;;  %v27_v22 = vrot.slane %v18_v8, %v1139_v5  ;;  %v450_v24 = vld [vmem:[%s1545_s3] sm:$0x3]  ;;  %v935_v8 = vld [vmem:[%s1547_s0 + $0xc] sm:$0x77]  ;;  %s1101_s14 = smov 110   ;;  %s1102_s28 = smov 96  }
   0x9   :  { %v112_v25 = vcombine.low %v107_v14, %v111_v15  ;;  %v322_v26 = vcombine.low %v317_v16, %v321_v17  ;;  %v17_v27 = vld [vmem:[%s1547_s0] sm:$0x77]  ;;  %v357_v28 = vrot.slane %v352_v13, %v1137_v4  ;;  %v361_v29 = vrot.slane %v352_v13, %v1139_v5  ;;  %v245_v15 = vld [vmem:[%s1547_s0 + $0x8] sm:$0x7]  ;;  %v1236_v16 = vld [vmem:[%s1547_s0 + $0xc] sm:$0x77] }
   0xa   :  { %v205_v30 = vld [vmem:[%s1546_s2] sm:$0x3]  ;;  %70 = vrot.lane.b32.xlu0 %v69_v19, %s1089_s11  ;;  %173 = vrot.lane.b32.xlu1 %v172_v20, %s1090_s12  ;;  %v28_v31 = vcombine.low %v23_v21, %v27_v22  ;;  %v398_v32 = vrot.slane %v393_v18, %v1137_v4  ;;  %v402_v33 = vrot.slane %v393_v18, %v1139_v5  ;;  %v335_v13 = vrot.slane %v929_v63, 5  ;;  %v942_v20 = vld [vmem:[%s1547_s0 + $0x14] sm:$0x7] }
   0xb   :  { %v491_v34 = vld [vmem:[%s1546_s2] sm:$0x3]  ;;  %v324_v35 = vmul.f32 %v928_v23, %v322_v26  ;;  %v362_v36 = vcombine.low %v357_v28, %v361_v29  ;;  %v455_v37 = vrot.slane %v450_v24, %v1137_v4  ;;  %v459_v38 = vrot.slane %v450_v24, %v1139_v5 }
   0xc   :  { %v30_v39 = vmul.f32 %v28_v31, %v17_v27  ;;  %v210_v40 = vrot.slane %v205_v30, %v1137_v4  ;;  %v214_v42 = vrot.slane %v205_v30, %v1139_v5  ;;  %v496_v43 = vrot.slane %v491_v34, %v1137_v4  ;;  %v267_v48 = vld [vmem:[%s1545_s3] sm:$0x3] }
   0xd   :  { %v326_v41 = vcombine.high %v324_v35, %v324_v35  ;;  %328 = vst [vmem:[#allocation2 + $0x10] sm:$0x7] %v324_v35  ;;  %v500_v44 = vrot.slane %v491_v34, %v1139_v5  ;;  %v403_v46 = vcombine.low %v398_v32, %v402_v33  ;;  %v460_v47 = vcombine.low %v455_v37, %v459_v38  ;;  %v550_v49 = vld [vmem:[%s1545_s3] sm:$0x3]  ;;  %v266_v35 = vld [vmem:[%s1547_s0 + $0x8] sm:$0x7] }
   0xe   :  { %113 = vrot.lane.b32.xlu0 %v112_v25, %s1091_s15  ;;  %v32_v45 = vcombine.high %v30_v39, %v30_v39  ;;  %34 = vst [vmem:[#allocation2] sm:$0x7] %v30_v39  ;;  %363 = vrot.lane.b32.xlu1 %v362_v36, %s1089_s11  ;;  %v215_v50 = vcombine.low %v210_v40, %v214_v42  ;;  %v36_v56 = vld [vmem:[%s1547_s0] sm:$0x77]  ;;  %v251_v17 = vrot.slane %v245_v15, 3  ;;  %v535_v21 = vrot.slane %v942_v20, 3 }
   0xf   :  { %329 = vst [vmem:[#allocation2 + $0x18] sm:$0x7] %v326_v41  ;;  %v501_v51 = vcombine.low %v496_v43, %v500_v44  ;;  %v272_v52 = vrot.slane %v267_v48, %v1137_v4  ;;  %v276_v53 = vrot.slane %v267_v48, %v1139_v5  ;;  %v555_v54 = vrot.slane %v550_v49, %v1137_v4  ;;  %v141_v3 = vld [vmem:[%s1547_s0] sm:$0x77]  ;;  %v930_v4 = vld [vmem:[%s1547_s0 + $0x14] sm:$0x7] }
  0x10   :  { %35 = vst [vmem:[#allocation2 + $0x8] sm:$0x7] %v32_v45  ;;  %v559_v55 = vrot.slane %v550_v49, %v1139_v5  ;;  %v40_v59 = vcombine.high %v36_v56, %v36_v56  ;;  %v334_v2 = vcombine.high %v929_v63, %v929_v63  ;;  %v337_v6 = vrot.slane %v930_v4, 5  ;;  %v244_v11 = vld [vmem:[%s1547_s0] sm:$0x77] }
  0x11   :  { %v277_v57 = vcombine.low %v272_v52, %v276_v53  ;;  %v145_v9 = vcombine.low %v141_v3, %v141_v3  ;;  %v41_v10 = vrot.slane %v36_v56, 5  ;;  %v434_v12 = vcombine.low %v935_v8, %v935_v8  ;;  %v100_v33 = vld [vmem:[%s1547_s0] sm:$0x77]  ;;  %v944_v42 = vld [vmem:[%s1547_s0 + $0x14] sm:$0x7] }
  0x12   :  { %404 = vrot.lane.b32.xlu0 %v403_v46, %s1091_s15  ;;  %461 = vrot.lane.b32.xlu1 %v460_v47, %s1090_s12  ;;  %v560_v58 = vcombine.low %v555_v54, %v559_v55  ;;  %v42_v61 = vrot.slane %v40_v59, 5  ;;  %v336_v5 = vrot.slane %v334_v2, 5  ;;  %v248_v14 = vcombine.high %v244_v11, %v244_v11  ;;  %v265_v39 = vld [vmem:[%s1547_s0] sm:$0x77]  ;;  %v58_v46 = vld [vmem:[%s1547_s0 + $0x8] sm:$0x7] }
  0x13   :  { %v532_v19 = vcombine.high %v1236_v16, %v1236_v16  ;;  %v249_v23 = vrot.slane %v244_v11, 3  ;;  %vm153_vm4 = vcmask 908288   ;;  %vm73_vm5 = vcmask 15360  }
  0x14   :  { %v250_v18 = vrot.slane %v248_v14, 3  ;;  %vm305_vm6 = vcmp.lt.s32.totalorder %v20_v0, 256  ;;  %v1099_v2 = vmov 1.0   ;;  %vm219_vm7 = vcmask 261120  }
  0x15   :  { %v534_v22 = vrot.slane %v532_v19, 3  ;;  %308 = vst.msk [vmem:[#allocation2 + $0x63] ss:$8 sm:$0x3] %vm305_vm6, %v1099_v2  ;;  %vm258_vm8 = vcmask 777216   ;;  %vm296_vm9 = vcmask 769024  }
  0x16   :  { %216 = vrot.lane.b32.xlu0 %v215_v50, %s1092_s21  ;;  %502 = vrot.lane.b32.xlu1 %v501_v51, %s1092_s21  ;;  %v160_v51 = vld [vmem:[%s1547_s0] sm:$0x77]  ;;  %585 = vst.msk [vmem:[#allocation2 + $0x73] ss:$8 sm:$0x3] %vm305_vm6, %v1099_v2  ;;  %vm91_vm10 = vcmask 1031168  }
  0x17   :  { %vm134_vm11 = vcmask 916480   ;;  %vm194_vm12 = vcmask 900096   ;;  %vm237_vm13 = vcmask 785408   ;;  %vm620_vm14 = vcmask 1043456  }
  0x18   :  { %vm1104_vm15 = vmmov 1  }
  0x1a   :  { %278 = vrot.lane.b32.xlu0 %v277_v57, %s1093_s23  ;;  %561 = vrot.lane.b32.xlu1 %v560_v58, %s1093_s23  ;;  %v101_v58 = vld [vmem:[%s1547_s0 + $0x8] sm:$0x7] }
  0x1e   :  { %46 = vrot.lane.b32.xlu0 %v42_v61, %s1094_s26  ;;  %48 = vrot.lane.b32.xlu1 %v43_v62, %s1094_s26  ;;  %v931_v62 = vld [vmem:[%s1547_s0 + $0xc] sm:$0x77] }
  0x22   :  { %149 = vrot.lane.b32.xlu0 %v141_v3, %s1095_s7  ;;  %151 = vrot.lane.b32.xlu1 %v1019_v1, %s1095_s7 }
  0x26   :  { %340 = vrot.lane.b32.xlu0 %v336_v5, %s1094_s26  ;;  %342 = vrot.lane.b32.xlu1 %v337_v6, %s1094_s26  ;;  %v161_v5 = vld [vmem:[%s1547_s0 + $0x8] sm:$0x7] }
  0x2a   :  { %438 = vrot.lane.b32.xlu0 %v935_v8, %s1095_s7  ;;  %440 = vrot.lane.b32.xlu1 %v1022_v7, %s1095_s7 }
  0x2e   :  { %44 = vrot.lane.b32.xlu0 %v41_v10, %s1094_s26  ;;  %147 = vrot.lane.b32.xlu1 %v145_v9, %s1095_s7 }
  0x32   :  { %338 = vrot.lane.b32.xlu1 %v335_v13, %s1094_s26  ;;  %436 = vrot.lane.b32.xlu0 %v434_v12, %s1095_s7  ;;  %v932_v12 = vld [vmem:[%s1547_s0 + $0x14] sm:$0x7] }
  0x36   :  { %256 = vrot.lane.b32.xlu1 %v251_v17, %s1096_s19  ;;  %254 = vrot.lane.b32.xlu0 %v250_v18, %s1096_s19  ;;  %v943_v18 = vld [vmem:[%s1547_s0 + $0xc] sm:$0x77] }
  0x3a   :  { %540 = vrot.lane.b32.xlu1 %v535_v21, %s1096_s19  ;;  %538 = vrot.lane.b32.xlu0 %v534_v22, %s1096_s19 }
  0x3e   :  { %252 = vrot.lane.b32.xlu1 %v249_v23, %s1096_s19 }
  0x7c   :  { %v1248_v24 = vpop.permute.xlu0 %70  ;;  %v1250_v25 = vpop.permute.xlu1 %173 }
  0x7d   :  { %v175_v37 = vrot.slane %v1250_v25, 4  ;;  %v72_v43 = vrot.slane %v1248_v24, 4 }
  0x7f   :  { %v177_v52 = vsel %vm176_vm2, %v175_v37, %v1250_v25  ;;  %v78_v56 = vmul.f32 %v72_v43, %v58_v46  ;;  %v181_v10 = vmul.f32 %v175_v37, %v161_v5  ;;  %v934_v25 = vld [vmem:[%s1547_s0 + $0x14] sm:$0x7] }
  0x80   :  { %v114_v26 = vpop.permute.xlu0 %113  ;;  %v1252_v27 = vpop.permute.xlu1 %363  ;;  %v1303_v57 = vmul.f32 %v177_v52, %v160_v51  ;;  %v204_v52 = vld [vmem:[%s1547_s0 + $0x8] sm:$0x7] }
  0x81   :  { %v115_v32 = vrot.slane %v114_v26, 4  ;;  %v365_v53 = vrot.slane %v1252_v27, 4  ;;  %v84_v4 = vrot.slane %v78_v56, 2  ;;  %v187_v23 = vrot.slane %v181_v10, 1 }
  0x82   :  { %v185_v7 = vrot.slane %v1303_v57, 1 }
  0x83   :  { %v117_v38 = vsel %vm116_vm0, %v115_v32, %v114_v26  ;;  %v366_v63 = vsel %vm73_vm5, %v365_v53, %v1252_v27  ;;  %v121_v3 = vmul.f32 %v115_v32, %v101_v58  ;;  %v370_v21 = vmul.f32 %v932_v12, %v365_v53 }
  0x84   :  { %v1254_v28 = vpop.permute.xlu0 %404  ;;  %v1256_v29 = vpop.permute.xlu1 %461  ;;  %v1284_v47 = vmul.f32 %v117_v38, %v100_v33  ;;  %v1321_v6 = vmul.f32 %v931_v62, %v366_v63 }
  0x85   :  { %v127_v11 = vrot.slane %v121_v3, 7  ;;  %v406_v22 = vrot.slane %v1254_v28, 4  ;;  %v463_v46 = vrot.slane %v1256_v29, 4 }
  0x86   :  { %v125_v59 = vrot.slane %v1284_v47, 7  ;;  %v374_v13 = vrot.slane %v1321_v6, 2  ;;  %v124_v63 = vcombine.high %v1284_v47, %v1284_v47 }
  0x87   :  { %v407_v10 = vsel %vm116_vm0, %v406_v22, %v1254_v28  ;;  %v464_v28 = vsel %vm176_vm2, %v463_v46, %v1256_v29  ;;  %vm1457_vm0 = vmpackc.low %vm620_vm14, %vm1104_vm15 }
  0x88   :  { %v1258_v30 = vpop.permute.xlu0 %216  ;;  %v1260_v31 = vpop.permute.xlu1 %502 }
  0x89   :  { %v218_v17 = vrot.slane %v1258_v30, 4  ;;  %v504_v3 = vrot.slane %v1260_v31, 4 }
  0x8b   :  { %v220_v37 = vsel %vm219_vm7, %v218_v17, %v1258_v30  ;;  %v938_v30 = vld [vmem:[%s1547_s0 + $0x14] sm:$0x7]  ;;  %v505_v29 = vsel %vm219_vm7, %v504_v3, %v1260_v31 }
  0x8c   :  { %v279_v34 = vpop.permute.xlu0 %278  ;;  %v1268_v36 = vpop.permute.xlu1 %561 }
  0x8d   :  { %v280_v40 = vrot.slane %v279_v34, 4  ;;  %v563_v41 = vrot.slane %v1268_v36, 4 }
  0x8f   :  { %v282_v44 = vsel %vm281_vm1, %v280_v40, %v279_v34  ;;  %v286_v45 = vmul.f32 %v280_v40, %v266_v35  ;;  %v568_v54 = vmul.f32 %v944_v42, %v563_v41  ;;  %v564_v19 = vsel %vm281_vm1, %v563_v41, %v1268_v36  ;;  %v57_v34 = vld [vmem:[%s1547_s0] sm:$0x77] }
  0x90   :  { %v1286_v48 = vmul.f32 %v282_v44, %v265_v39  ;;  %v1288_v49 = vpop.permute.xlu0 %46  ;;  %v49_v50 = vpop.permute.xlu1 %48  ;;  %v1344_v26 = vmul.f32 %v943_v18, %v564_v19  ;;  %v74_v35 = vsel %vm73_vm5, %v72_v43, %v1248_v24  ;;  %v203_v36 = vld [vmem:[%s1547_s0] sm:$0x77]  ;;  %v411_v24 = vmul.f32 %v934_v25, %v406_v22 }
  0x91   :  { %294 = vrot.lane.b32.xlu1 %v286_v45, %s1097_s5  ;;  %v52_v55 = vsel %vm50_vm3, %v1288_v49, %v49_v50  ;;  %v376_v40 = vrot.slane %v370_v21, 2  ;;  %v77_v41 = vmul.f32 %v74_v35, %v57_v34  ;;  %v1370_v42 = vmul.f32 %v220_v37, %v203_v36  ;;  %v939_v21 = vld [vmem:[%s1547_s0 + $0xc] sm:$0x77] }
  0x92   :  { %290 = vrot.lane.b32.xlu0 %v1286_v48, %s1097_s5  ;;  %56 = vst [vmem:[#allocation2 + $0x8] sm:$0x38] %v52_v55  ;;  %v289_v27 = vcombine.high %v1286_v48, %v1286_v48  ;;  %v571_v43 = vcombine.high %v1344_v26, %v1344_v26  ;;  %v468_v50 = vmul.f32 %v938_v30, %v463_v46  ;;  %v417_v51 = vrot.slane %v411_v24, 7 }
  0x93   :  { %v228_v53 = vrot.slane %v1370_v42, 6  ;;  %v508_v25 = vmul.f32 %v939_v21, %v505_v29  ;;  %v533_v37 = vrot.slane %v1236_v16, 3  ;;  %vm607_vm1 = vcmask 228352  }
  0x94   :  { %v150_v60 = vpop.permute.xlu0 %149  ;;  %v152_v61 = vpop.permute.xlu1 %151 }
  0x95   :  { %576 = vrot.lane.b32.xlu1 %v568_v54, %s1097_s5  ;;  %v155_v1 = vsel %vm153_vm4, %v150_v60, %v152_v61  ;;  %v81_v54 = vcombine.high %v77_v41, %v77_v41  ;;  %v940_v61 = vld [vmem:[%s1547_s0 + $0x14] sm:$0x7]  ;;  %v513_v34 = vrot.slane %v508_v25, 6  ;;  %v512_v36 = vcombine.high %v508_v25, %v508_v25 }
  0x96   :  { %128 = vrot.lane.b32.xlu0 %v125_v59, %s1098_s10  ;;  %159 = vst [vmem:[#allocation2 + $0x28] sm:$0x70] %v155_v1  ;;  %v224_v59 = vmul.f32 %v218_v17, %v204_v52  ;;  %v509_v5 = vmul.f32 %v940_v61, %v504_v3  ;;  %v82_v17 = vrot.slane %v77_v41, 2 }
  0x97   :  { %v83_v62 = vrot.slane %v81_v54, 2  ;;  %v514_v31 = vrot.slane %v512_v36, 6 }
  0x98   :  { %v341_v8 = vpop.permute.xlu0 %340  ;;  %v343_v9 = vpop.permute.xlu1 %342  ;;  %v515_v12 = vrot.slane %v509_v5, 6 }
  0x99   :  { %89 = vrot.lane.b32.xlu1 %v84_v4, %s1100_s13  ;;  %v345_v0 = vsel %vm50_vm3, %v341_v8, %v343_v9  ;;  %v184_v9 = vcombine.high %v1303_v57, %v1303_v57 }
  0x9a   :  { %188 = vrot.lane.b32.xlu0 %v185_v7, %s1101_s14  ;;  %349 = vst [vmem:[#allocation2 + $0x18] sm:$0x38] %v345_v0  ;;  %v230_v7 = vrot.slane %v224_v59, 6  ;;  %v933_v0 = vld [vmem:[%s1547_s0 + $0xc] sm:$0x77] }
  0x9b   :  { %v186_v57 = vrot.slane %v184_v9, 1 }
  0x9c   :  { %v439_v14 = vpop.permute.xlu0 %438  ;;  %v441_v15 = vpop.permute.xlu1 %440 }
  0x9d   :  { %132 = vrot.lane.b32.xlu1 %v127_v11, %s1098_s10  ;;  %v443_v20 = vsel %vm153_vm4, %v439_v14, %v441_v15  ;;  %v937_v15 = vld [vmem:[%s1547_s0 + $0xc] sm:$0x77] }
  0x9e   :  { %377 = vrot.lane.b32.xlu0 %v374_v13, %s1100_s13  ;;  %447 = vst [vmem:[#allocation2 + $0x38] sm:$0x70] %v443_v20  ;;  %v410_v13 = vmul.f32 %v933_v0, %v407_v10  ;;  %v467_v18 = vmul.f32 %v937_v15, %v464_v28 }
  0xa0   :  { %v45_v32 = vpop.permute.xlu0 %44  ;;  %v148_v33 = vpop.permute.xlu1 %147  ;;  %v414_v20 = vcombine.high %v410_v13, %v410_v13 }
  0xa1   :  { %192 = vrot.lane.b32.xlu1 %v187_v23, %s1101_s14  ;;  %v51_v38 = vsel %vm50_vm3, %v45_v32, %v1288_v49  ;;  %v154_v39 = vsel %vm153_vm4, %v148_v33, %v150_v60  ;;  %v474_v60 = vrot.slane %v468_v50, 1  ;;  %v471_v23 = vcombine.high %v467_v18, %v467_v18 }
  0xa2   :  { %292 = vrot.lane.b32.xlu0 %v289_v27, %s1097_s5  ;;  %55 = vst [vmem:[#allocation2] sm:$0x38] %v51_v38  ;;  %158 = vst [vmem:[#allocation2 + $0x20] sm:$0x70] %v154_v39  ;;  %v416_v22 = vrot.slane %v414_v20, 7  ;;  %v472_v27 = vrot.slane %v467_v18, 1  ;;  %v227_v33 = vcombine.high %v1370_v42, %v1370_v42 }
  0xa3   :  { %v473_v32 = vrot.slane %v471_v23, 1  ;;  %v1103_v38 = vmov 0.0  }
  0xa4   :  { %v339_v44 = vpop.permute.xlu1 %338  ;;  %v437_v45 = vpop.permute.xlu0 %436  ;;  %v229_v35 = vrot.slane %v227_v33, 6  ;;  %697 = vmatprep.mubr.f32.mxu0 %v1103_v38  ;;  %786 = vmatprep.mubr.f32.mxu1 %v1103_v38 }
  0xa5   :  { %381 = vrot.lane.b32.xlu1 %v376_v40, %s1100_s13  ;;  %v344_v48 = vsel %vm50_vm3, %v339_v44, %v341_v8  ;;  %v442_v49 = vsel %vm153_vm4, %v437_v45, %v439_v14  ;;  %v126_v8 = vrot.slane %v124_v63, 7  ;;  %v373_v14 = vcombine.high %v1321_v6, %v1321_v6 }
  0xa6   :  { %574 = vrot.lane.b32.xlu0 %v571_v43, %s1097_s5  ;;  %348 = vst [vmem:[#allocation2 + $0x10] sm:$0x38] %v344_v48  ;;  %446 = vst [vmem:[#allocation2 + $0x30] sm:$0x70] %v442_v49  ;;  %v415_v6 = vrot.slane %v410_v13, 7 }
  0xa7   :  { %v375_v19 = vrot.slane %v373_v14, 2 }
  0xa8   :  { %v257_v55 = vpop.permute.xlu1 %256  ;;  %v255_v56 = vpop.permute.xlu0 %254 }
  0xa9   :  { %422 = vrot.lane.b32.xlu1 %v417_v51, %s1098_s10  ;;  %v260_v58 = vsel %vm258_vm8, %v255_v56, %v257_v55 }
  0xaa   :  { %231 = vrot.lane.b32.xlu0 %v228_v53, %s1102_s28  ;;  %264 = vst [vmem:[#allocation2 + $0x48] sm:$0xe0] %v260_v58 }
  0xac   :  { %v541_v1 = vpop.permute.xlu1 %540  ;;  %v1391_v2 = vpop.permute.xlu0 %538 }
  0xad   :  { %479 = vrot.lane.b32.xlu1 %v474_v60, %s1101_s14  ;;  %v543_v4 = vsel %vm258_vm8, %v1391_v2, %v541_v1 }
  0xae   :  { %87 = vrot.lane.b32.xlu0 %v83_v62, %s1100_s13  ;;  %547 = vst [vmem:[#allocation2 + $0x58] sm:$0xe0] %v543_v4 }
  0xb0   :  { %v253_v47 = vpop.permute.xlu1 %252 }
  0xb1   :  { %235 = vrot.lane.b32.xlu1 %v230_v7, %s1102_s28  ;;  %v259_v11 = vsel %vm258_vm8, %v253_v47, %v255_v56 }
  0xb2   :  { %130 = vrot.lane.b32.xlu0 %v126_v8, %s1098_s10  ;;  %263 = vst [vmem:[#allocation2 + $0x40] sm:$0xe0] %v259_v11 }
  0xb5   :  { %520 = vrot.lane.b32.xlu1 %v515_v12, %s1102_s28 }
  0xb6   :  { %190 = vrot.lane.b32.xlu0 %v186_v57, %s1101_s14 }
  0xb9   :  { %85 = vrot.lane.b32.xlu1 %v82_v17, %s1100_s13 }
  0xba   :  { %379 = vrot.lane.b32.xlu0 %v375_v19, %s1100_s13 }
  0xbd   :  { %418 = vrot.lane.b32.xlu1 %v415_v6, %s1098_s10 }
  0xbe   :  { %420 = vrot.lane.b32.xlu0 %v416_v22, %s1098_s10 }
  0xc1   :  { %475 = vrot.lane.b32.xlu1 %v472_v27, %s1101_s14 }
  0xc2   :  { %477 = vrot.lane.b32.xlu0 %v473_v32, %s1101_s14 }
  0xc5   :  { %516 = vrot.lane.b32.xlu1 %v513_v34, %s1102_s28 }
  0xc6   :  { %233 = vrot.lane.b32.xlu0 %v229_v35, %s1102_s28 }
  0xc9   :  { %572 = vrot.lane.b32.xlu1 %v1344_v26, %s1097_s5 }
  0xca   :  { %518 = vrot.lane.b32.xlu0 %v514_v31, %s1102_s28 }
  0xce   :  { %536 = vrot.lane.b32.xlu0 %v533_v37, %s1096_s19 }
 0x103   :  { %v295_v39 = vpop.permute.xlu1 %294 }
 0x104   :  { %v291_v24 = vpop.permute.xlu0 %290 }
 0x107   :  { %v577_v40 = vpop.permute.xlu1 %576 }
 0x108   :  { %v129_v41 = vpop.permute.xlu0 %128 }
 0x10b   :  { %v90_v30 = vpop.permute.xlu1 %89 }
 0x10c   :  { %v189_v42 = vpop.permute.xlu0 %188 }
 0x10f   :  { %v133_v43 = vpop.permute.xlu1 %132 }
 0x110   :  { %v378_v44 = vpop.permute.xlu0 %377 }
 0x113   :  { %v193_v26 = vpop.permute.xlu1 %192 }
 0x114   :  { %v293_v45 = vpop.permute.xlu0 %292 }
 0x115   :  { %v297_v16 = vsel %vm296_vm9, %v291_v24, %v293_v45  ;;  %v298_v46 = vsel %vm296_vm9, %v293_v45, %v295_v39 }
 0x116   :  { %301 = vst [vmem:[#allocation2 + $0x60] sm:$0x7] %v297_v16  ;;  %302 = vst [vmem:[#allocation2 + $0x68] sm:$0x7] %v298_v46  ;;  %v587_v46 = vld [vmem:[%s1548_s1] sm:$0xff] }
 0x117   :  { %v382_v48 = vpop.permute.xlu1 %381 }
 0x118   :  { %v575_v49 = vpop.permute.xlu0 %574 }
 0x119   :  { %v579_v50 = vsel %vm296_vm9, %v575_v49, %v577_v40 }
 0x11a   :  { %583 = vst [vmem:[#allocation2 + $0x78] sm:$0x7] %v579_v50  ;;  %v588_v50 = vld [vmem:[%s1548_s1 + $0x8] sm:$0xff] }
 0x11b   :  { %v423_v51 = vpop.permute.xlu1 %422 }
 0x11c   :  { %v232_v52 = vpop.permute.xlu0 %231 }
 0x11d   :  { %v604_v24 = vld [vmem:[#allocation2 + $0x68] sm:$0xf] }
 0x11f   :  { %v480_v53 = vpop.permute.xlu1 %479 }
 0x120   :  { %v88_v54 = vpop.permute.xlu0 %87 }
 0x121   :  { %v93_v55 = vsel %vm91_vm10, %v88_v54, %v90_v30  ;;  %v606_v16 = vld [vmem:[#allocation2 + $0x78] sm:$0xf] }
 0x122   :  { %97 = vst [vmem:[#allocation2 + $0x28] ss:$-28 sps:$4 sm:$0xc1] %v93_v55  }
 0x123   :  { %v236_v56 = vpop.permute.xlu1 %235 }
 0x124   :  { %v131_v58 = vpop.permute.xlu0 %130 }
 0x125   :  { %v135_v59 = vsel %vm134_vm11, %v129_v41, %v131_v58  ;;  %v136_v60 = vsel %vm134_vm11, %v131_v58, %v133_v43  ;;  %v603_v43 = vld [vmem:[#allocation2 + $0x60] sm:$0xf] }
 0x126   :  { %139 = vst [vmem:[#allocation2 + $0x20] sm:$0xe] %v135_v59  ;;  %140 = vst [vmem:[#allocation2 + $0x28] sm:$0xe] %v136_v60 }
 0x127   :  { %v521_v61 = vpop.permute.xlu1 %520 }
 0x128   :  { %v191_v62 = vpop.permute.xlu0 %190 }
 0x129   :  { %v195_v63 = vsel %vm194_vm12, %v189_v42, %v191_v62  ;;  %v196_v1 = vsel %vm194_vm12, %v191_v62, %v193_v26  ;;  %v592_v11 = vld [vmem:[#allocation2 + $0x8] sm:$0xff] }
 0x12a   :  { %199 = vst [vmem:[#allocation2 + $0x40] ss:$-28 sps:$4 sm:$0x83] %v195_v63   ;;  %200 = vst [vmem:[#allocation2 + $0x48] ss:$-28 sps:$4 sm:$0x83] %v196_v1  }
 0x12b   :  { %v86_v3 = vpop.permute.xlu1 %85 }
 0x12c   :  { %v92_v4 = vsel %vm91_vm10, %v86_v3, %v88_v54  ;;  %v380_v5 = vpop.permute.xlu0 %379 }
 0x12d   :  { %96 = vst [vmem:[#allocation2 + $0x20] ss:$-28 sps:$4 sm:$0xc1] %v92_v4   ;;  %v383_v7 = vsel %vm91_vm10, %v378_v44, %v380_v5  ;;  %v384_v8 = vsel %vm91_vm10, %v380_v5, %v382_v48 }
 0x12e   :  { %387 = vst [vmem:[#allocation2 + $0x30] ss:$-28 sps:$4 sm:$0xc1] %v383_v7   ;;  %388 = vst [vmem:[#allocation2 + $0x38] ss:$-28 sps:$4 sm:$0xc1] %v384_v8  }
 0x12f   :  { %v419_v9 = vpop.permute.xlu1 %418 }
 0x130   :  { %v421_v47 = vpop.permute.xlu0 %420 }
 0x131   :  { %v424_v0 = vsel %vm134_vm11, %v419_v9, %v421_v47  ;;  %v425_v10 = vsel %vm134_vm11, %v421_v47, %v423_v51  ;;  %v596_v12 = vld [vmem:[#allocation2 + $0x28] sm:$0xff] }
 0x132   :  { %428 = vst [vmem:[#allocation2 + $0x30] sm:$0xe] %v424_v0  ;;  %429 = vst [vmem:[#allocation2 + $0x38] sm:$0xe] %v425_v10  ;;  %v981_v13 = vpack.c.bf16 %v596_v12, %v592_v11 }
 0x133   :  { %v476_v57 = vpop.permute.xlu1 %475 }
 0x134   :  { %v478_v14 = vpop.permute.xlu0 %477  ;;  %982 = vmatprep.subr.bf16.mxu0 %v981_v13  ;;  %v591_v15 = vld [vmem:[#allocation2] sm:$0xff] }
 0x135   :  { %v595_v28 = vld [vmem:[#allocation2 + $0x20] sm:$0xff]  ;;  %v481_v17 = vsel %vm194_vm12, %v476_v57, %v478_v14  ;;  %v482_v18 = vsel %vm194_vm12, %v478_v14, %v480_v53  ;;  %v594_v27 = vld [vmem:[#allocation2 + $0x18] sm:$0xff]  ;;  %v593_v35 = vld [vmem:[#allocation2 + $0x10] sm:$0xff] }
 0x136   :  { %v983_v19 = vpack.c.bf16 %v595_v28, %v591_v15  ;;  %485 = vst [vmem:[#allocation2 + $0x50] ss:$-28 sps:$4 sm:$0x83] %v481_v17   ;;  %486 = vst [vmem:[#allocation2 + $0x58] ss:$-28 sps:$4 sm:$0x83] %v482_v18  }
 0x137   :  { %v517_v20 = vpop.permute.xlu1 %516  ;;  %v590_v53 = vld [vmem:[%s1548_s1 + $0x18] sm:$0xff] }
 0x138   :  { %984 = vmatpush1.bf16.msra.mxu0 %v983_v19  ;;  %v234_v6 = vpop.permute.xlu0 %233 }
 0x139   :  { %v238_v21 = vsel %vm237_vm13, %v232_v52, %v234_v6  ;;  %v239_v29 = vsel %vm237_vm13, %v234_v6, %v236_v56  ;;  %v589_v52 = vld [vmem:[%s1548_s1 + $0x10] sm:$0xff] }
 0x13a   :  { %242 = vst [vmem:[#allocation2 + $0x40] sm:$0x1c] %v238_v21  ;;  %243 = vst [vmem:[#allocation2 + $0x48] sm:$0x1c] %v239_v29 }
 0x13b   :  { %v573_v22 = vpop.permute.xlu1 %572 }
 0x13c   :  { %v578_v23 = vsel %vm296_vm9, %v573_v22, %v575_v49  ;;  %v519_v25 = vpop.permute.xlu0 %518 }
 0x13d   :  { %582 = vst [vmem:[#allocation2 + $0x70] sm:$0x7] %v578_v23  ;;  %v522_v32 = vsel %vm237_vm13, %v517_v20, %v519_v25  ;;  %v523_v33 = vsel %vm237_vm13, %v519_v25, %v521_v61  ;;  %v598_v34 = vld [vmem:[#allocation2 + $0x38] sm:$0xff]  ;;  %v597_v36 = vld [vmem:[#allocation2 + $0x30] sm:$0xff] }
 0x13e   :  { %526 = vst [vmem:[#allocation2 + $0x50] sm:$0x1c] %v522_v32  ;;  %527 = vst [vmem:[#allocation2 + $0x58] sm:$0x1c] %v523_v33  ;;  %v991_v31 = vpack.c.bf16 %v598_v34, %v594_v27  ;;  %v993_v37 = vpack.c.bf16 %v597_v36, %v593_v35 }
 0x140   :  { %992 = vmatprep.subr.bf16.mxu1 %v991_v31  ;;  %v537_v39 = vpop.permute.xlu0 %536 }
 0x141   :  { %v542_v41 = vsel %vm258_vm8, %v537_v39, %v1391_v2  ;;  %994 = vmatpush1.bf16.msra.mxu1 %v993_v37  ;;  %v600_v30 = vld [vmem:[#allocation2 + $0x48] sm:$0xff]  ;;  %v599_v42 = vld [vmem:[#allocation2 + $0x40] sm:$0xff] }
 0x142   :  { %546 = vst [vmem:[#allocation2 + $0x50] sm:$0xe0] %v542_v41  ;;  %v985_v44 = vpack.c.bf16 %v604_v24, %v600_v30  ;;  %v988_v26 = vpack.c.bf16 %v603_v43, %v599_v42 }
 0x144   :  { %987 = vmatprep.subr.msk.bf16.mxu0 %vm1457_vm0, %v985_v44  ;;  %v605_v49 = vld [vmem:[#allocation2 + $0x70] sm:$0xf] }
 0x145   :  { %990 = vmatpush1.bf16.msk.msra.mxu0 %vm1457_vm0, %v988_v26  ;;  %v602_v45 = vld [vmem:[#allocation2 + $0x58] sm:$0xff] }
 0x146   :  { %v995_v2 = vpack.c.bf16 %v606_v16, %v602_v45 }
 0x148   :  { %997 = vmatprep.subr.msk.bf16.mxu1 %vm1457_vm0, %v995_v2  ;;  %947 = vmatmul.mubr.msk.f32.vlgmr.msra.gmra.mrb[0].mxu0 %vm607_vm1, %v587_v46 }
 0x149   :  { %v601_v48 = vld [vmem:[#allocation2 + $0x50] sm:$0xff]  ;;  %703 = vmatprep.mubr.f32.mxu0 %v1103_v38 }
 0x14a   :  { %v998_v51 = vpack.c.bf16 %v605_v49, %v601_v48 }
 0x14c   :  { %1000 = vmatpush1.bf16.msk.msra.mxu1 %vm1457_vm0, %v998_v51  ;;  %948 = vmatmul.mubr.msk.f32.gmra.mrb[2].mxu0 %vm607_vm1, %v588_v50 }
 0x14d   :  { %709 = vmatprep.mubr.f32.mxu0 %v1103_v38 }
 0x14f   :  { %953 = vmatmul.mubr.msk.f32.vlgmr.msra.gmra.mrb[0].mxu1 %vm607_vm1, %v587_v46 }
 0x150   :  { %792 = vmatprep.mubr.f32.mxu1 %v1103_v38  ;;  %949 = vmatmul.mubr.msk.f32.gmra.mrb[4].mxu0 %vm607_vm1, %v589_v52 }
 0x151   :  { %715 = vmatprep.mubr.f32.mxu0 %v1103_v38 }
 0x153   :  { %954 = vmatmul.mubr.msk.f32.gmra.mrb[2].mxu1 %vm607_vm1, %v588_v50 }
 0x154   :  { %798 = vmatprep.mubr.f32.mxu1 %v1103_v38  ;;  %950 = vmatmul.mubr.msk.f32.gmra.mrb[6].mxu0 %vm607_vm1, %v590_v53 }
 0x157   :  { %955 = vmatmul.mubr.msk.f32.gmra.mrb[4].mxu1 %vm607_vm1, %v589_v52 }
 0x158   :  { %804 = vmatprep.mubr.f32.mxu1 %v1103_v38 }
 0x15b   :  { %956 = vmatmul.mubr.msk.f32.gmra.mrb[6].mxu1 %vm607_vm1, %v590_v53 }
 0x21b   :  { %v699_v54 = vpop.f32.mrb[0].mxu0 }
 0x21c   :  { %v957_v55 = vmul.f32 -1.442695, %v699_v54  ;;  %v701_v56 = vpop.f32.mrb[1].mxu0 }
 0x21d   :  { %v958_v58 = vmul.f32 -1.442695, %v701_v56 }
 0x21e   :  { %1025 = vpow2.f32 %v957_v55 }
 0x21f   :  { %1027 = vpow2.f32 %v958_v58  ;;  %v705_v59 = vpop.f32.mrb[2].mxu0 }
 0x220   :  { %v961_v60 = vmul.f32 -1.442695, %v705_v59  ;;  %v707_v61 = vpop.f32.mrb[3].mxu0 }
 0x221   :  { %v962_v62 = vmul.f32 -1.442695, %v707_v61 }
 0x222   :  { %v788_v63 = vpop.f32.mrb[0].mxu1  ;;  %1029 = vpow2.f32 %v961_v60 }
 0x223   :  { %v959_v1 = vmul.f32 -1.442695, %v788_v63  ;;  %v790_v3 = vpop.f32.mrb[1].mxu1  ;;  %1031 = vpow2.f32 %v962_v62  ;;  %v711_v4 = vpop.f32.mrb[4].mxu0 }
 0x224   :  { %v960_v5 = vmul.f32 -1.442695, %v790_v3  ;;  %v965_v38 = vmul.f32 -1.442695, %v711_v4  ;;  %v713_v7 = vpop.f32.mrb[5].mxu0 }
 0x225   :  { %1033 = vpow2.f32 %v959_v1  ;;  %v966_v8 = vmul.f32 -1.442695, %v713_v7 }
 0x226   :  { %1035 = vpow2.f32 %v960_v5  ;;  %v794_v9 = vpop.f32.mrb[2].mxu1 }
 0x227   :  { %v963_v47 = vmul.f32 -1.442695, %v794_v9  ;;  %v796_v0 = vpop.f32.mrb[3].mxu1  ;;  %1037 = vpow2.f32 %v965_v38  ;;  %v717_v10 = vpop.f32.mrb[6].mxu0 }
 0x228   :  { %v1026_v11 = vpop.eup %1025  ;;  %v964_v12 = vmul.f32 -1.442695, %v796_v0  ;;  %1039 = vpow2.f32 %v966_v8  ;;  %v719_v13 = vpop.f32.mrb[7].mxu0  ;;  %v969_v29 = vmul.f32 -1.442695, %v717_v10 }
 0x229   :  { %v1028_v57 = vpop.eup %1027  ;;  %v859_v14 = vadd.f32 1.0, %v1026_v11  ;;  %1041 = vpow2.f32 %v963_v47  ;;  %v970_v41 = vmul.f32 -1.442695, %v719_v13 }
 0x22a   :  { %v860_v15 = vadd.f32 1.0, %v1028_v57  ;;  %1043 = vpow2.f32 %v964_v12  ;;  %v800_v28 = vpop.f32.mrb[4].mxu1 }
 0x22b   :  { %1045 = vrcp.f32 %v859_v14  ;;  %v967_v17 = vmul.f32 -1.442695, %v800_v28  ;;  %v802_v18 = vpop.f32.mrb[5].mxu1 }
 0x22c   :  { %v1030_v19 = vpop.eup %1029  ;;  %1047 = vrcp.f32 %v860_v15  ;;  %v968_v20 = vmul.f32 -1.442695, %v802_v18 }
 0x22d   :  { %v1032_v6 = vpop.eup %1031  ;;  %v863_v21 = vadd.f32 1.0, %v1030_v19  ;;  %1049 = vpow2.f32 %v967_v17 }
 0x22e   :  { %v864_v22 = vadd.f32 1.0, %v1032_v6  ;;  %1051 = vpow2.f32 %v968_v20  ;;  %v806_v23 = vpop.f32.mrb[6].mxu1 }
 0x22f   :  { %v1034_v25 = vpop.eup %1033  ;;  %1053 = vrcp.f32 %v863_v21  ;;  %v808_v27 = vpop.f32.mrb[7].mxu1  ;;  %v971_v43 = vmul.f32 -1.442695, %v806_v23 }
 0x230   :  { %v1036_v32 = vpop.eup %1035  ;;  %v861_v33 = vadd.f32 1.0, %v1034_v25  ;;  %1055 = vrcp.f32 %v864_v22  ;;  %v972_v46 = vmul.f32 -1.442695, %v808_v27 }
 0x231   :  { %v1038_v34 = vpop.eup %1037  ;;  %v862_v35 = vadd.f32 1.0, %v1036_v32  ;;  %1057 = vpow2.f32 %v969_v29 }
 0x232   :  { %v1040_v36 = vpop.eup %1039  ;;  %1059 = vrcp.f32 %v861_v33  ;;  %v867_v31 = vadd.f32 1.0, %v1038_v34 }
 0x233   :  { %v1042_v37 = vpop.eup %1041  ;;  %1061 = vrcp.f32 %v862_v35  ;;  %v868_v39 = vadd.f32 1.0, %v1040_v36 }
 0x234   :  { %v1044_v24 = vpop.eup %1043  ;;  %v865_v40 = vadd.f32 1.0, %v1042_v37  ;;  %1063 = vrcp.f32 %v867_v31 }
 0x235   :  { %v1046_v30 = vpop.eup %1045  ;;  %v866_v42 = vadd.f32 1.0, %v1044_v24  ;;  %1065 = vrcp.f32 %v868_v39 }
 0x236   :  { %v1048_v44 = vpop.eup %1047  ;;  %907 = vst [vmem:[%s1549_s4] sm:$0xff] %v1046_v30  ;;  %1067 = vrcp.f32 %v865_v40 }
 0x237   :  { %v1050_v26 = vpop.eup %1049  ;;  %908 = vst [vmem:[%s1549_s4 + $0x8] sm:$0xff] %v1048_v44  ;;  %1069 = vrcp.f32 %v866_v42 }
 0x238   :  { %v1052_v45 = vpop.eup %1051  ;;  %v869_v16 = vadd.f32 1.0, %v1050_v26  ;;  %1071 = vpow2.f32 %v970_v41 }
 0x239   :  { %v1054_v2 = vpop.eup %1053  ;;  %v870_v48 = vadd.f32 1.0, %v1052_v45  ;;  %1073 = vpow2.f32 %v971_v43 }
 0x23a   :  { %v1056_v49 = vpop.eup %1055  ;;  %909 = vst [vmem:[%s1549_s4 + $0x10] sm:$0xff] %v1054_v2  ;;  %1075 = vrcp.f32 %v869_v16 }
 0x23b   :  { %v1058_v50 = vpop.eup %1057  ;;  %910 = vst [vmem:[%s1549_s4 + $0x18] sm:$0xff] %v1056_v49  ;;  %1077 = vrcp.f32 %v870_v48 }
 0x23c   :  { %v1060_v51 = vpop.eup %1059  ;;  %v871_v52 = vadd.f32 1.0, %v1058_v50  ;;  %1079 = vpow2.f32 %v972_v46 }
 0x23d   :  { %v1062_v53 = vpop.eup %1061  ;;  %973 = vst [vmem:[%s1549_s4 + $0x40] sm:$0xff] %v1060_v51 }
 0x23e   :  { %v1064_v54 = vpop.eup %1063  ;;  %974 = vst [vmem:[%s1549_s4 + $0x48] sm:$0xff] %v1062_v53  ;;  %1081 = vrcp.f32 %v871_v52 }
 0x23f   :  { %v1066_v55 = vpop.eup %1065  ;;  %911 = vst [vmem:[%s1549_s4 + $0x20] sm:$0xff] %v1064_v54 }
 0x240   :  { %v1068_v56 = vpop.eup %1067  ;;  %912 = vst [vmem:[%s1549_s4 + $0x28] sm:$0xff] %v1066_v55 }
 0x241   :  { %v1070_v58 = vpop.eup %1069  ;;  %975 = vst [vmem:[%s1549_s4 + $0x50] sm:$0xff] %v1068_v56 }
 0x242   :  { %v1072_v59 = vpop.eup %1071  ;;  %976 = vst [vmem:[%s1549_s4 + $0x58] sm:$0xff] %v1070_v58 }
 0x243   :  { %v1074_v60 = vpop.eup %1073  ;;  %v872_v61 = vadd.f32 1.0, %v1072_v59 }
 0x244   :  { %v1076_v62 = vpop.eup %1075  ;;  %v873_v63 = vadd.f32 1.0, %v1074_v60 }
 0x245   :  { %v1078_v1 = vpop.eup %1077  ;;  %977 = vst [vmem:[%s1549_s4 + $0x60] sm:$0xff] %v1076_v62  ;;  %1083 = vrcp.f32 %v872_v61 }
 0x246   :  { %v1080_v3 = vpop.eup %1079  ;;  %978 = vst [vmem:[%s1549_s4 + $0x68] sm:$0xff] %v1078_v1  ;;  %1085 = vrcp.f32 %v873_v63 }
 0x247   :  { %v874_v4 = vadd.f32 1.0, %v1080_v3 }
 0x248   :  { %v1082_v5 = vpop.eup %1081 }
 0x249   :  { %913 = vst [vmem:[%s1549_s4 + $0x30] sm:$0xff] %v1082_v5  ;;  %1087 = vrcp.f32 %v874_v4 }
 0x24f   :  { %v1084_v38 = vpop.eup %1083 }
 0x250   :  { %v1086_v7 = vpop.eup %1085  ;;  %914 = vst [vmem:[%s1549_s4 + $0x38] sm:$0xff] %v1084_v38 }
 0x251   :  { %979 = vst [vmem:[%s1549_s4 + $0x70] sm:$0xff] %v1086_v7 }
 0x253   :  { %v1088_v8 = vpop.eup %1087 }
 0x254   :  { %980 = vst [vmem:[%s1549_s4 + $0x78] sm:$0xff] %v1088_v8 }

</bundles_post_ra>
